<compile_context>
chip_gen: v7x
topology: tpu7x:2x2x1
jax: 0.10.0
libtpu: 0.0.40
codegen_flags: <defaults>
</compile_context>

<pallas_src>
import jax
import jax.numpy as jnp
from jax.experimental import pallas as pl
from jax.experimental.pallas import tpu as pltpu

HID1 = 64
HID2 = 64


def _cdiv(a, b):
    return -(-a // b)


def _round_up(a, m):
    return _cdiv(a, m) * m


def actor_mlp_kernel(x_ref, w1_ref, b1_ref, w2_ref, b2_ref, w3_ref, b3_ref, out_ref):
    """relu(x@W1+b1) -> relu(.@W2+b2) -> .@W3+b3 for one (folded) batch tile.

    MXU operands are cast to the weight dtype (bf16 by default) inside the kernel;
    accumulation, bias add and ReLU stay f32.
    """
    x = x_ref[...].astype(w1_ref.dtype)
    h1 = jnp.dot(x, w1_ref[...], preferred_element_type=jnp.float32) + b1_ref[...]
    h1 = jnp.maximum(h1, 0.0)
    h2 = jnp.dot(h1.astype(w2_ref.dtype), w2_ref[...],
                 preferred_element_type=jnp.float32) + b2_ref[...]
    h2 = jnp.maximum(h2, 0.0)
    out = jnp.dot(h2.astype(w3_ref.dtype), w3_ref[...],
                  preferred_element_type=jnp.float32) + b3_ref[...]
    out_ref[...] = out.astype(out_ref.dtype)


def _block_diag(w, fold, dtype):
    """(din, dout) -> (fold*din, fold*dout) with `fold` copies of w on the diagonal."""
    din, dout = w.shape
    out = jnp.zeros((fold * din, fold * dout), dtype)
    w = w.astype(dtype)
    for f in range(fold):
        out = out.at[f * din:(f + 1) * din, f * dout:(f + 1) * dout].set(w)
    return out


def prepare_params(params, *, fold=4, mxu_dtype=jnp.bfloat16):
    """One-time weight prep: block-diagonal folded weights (cast once to mxu_dtype)
    and lane-tiled f32 biases.  fold=4 for v6e/v7x (256x256 MXU), fold=2 for v5e."""
    obs_dim = params["w1"].shape[0]
    act_dim = params["w3"].shape[1]
    return {
        "fold": fold,
        "obs_dim": obs_dim,
        "act_dim": act_dim,
        "w1": _block_diag(params["w1"], fold, mxu_dtype),
        "b1": jnp.tile(params["b1"].astype(jnp.float32), (1, fold)),
        "w2": _block_diag(params["w2"], fold, mxu_dtype),
        "b2": jnp.tile(params["b2"].astype(jnp.float32), (1, fold)),
        "w3": _block_diag(params["w3"], fold, mxu_dtype),
        "b3": jnp.tile(params["b3"].astype(jnp.float32), (1, fold)),
    }


def _choose_tiling(batch, fold, *, max_rows_per_tile=8192):
    """Pick (padded_batch, folded_batch, folded_tile, n_tiles) from the batch size."""
    row_align = fold * 8                      # folded rows must be a multiple of 8
    pb = _round_up(batch, row_align)
    bf = pb // fold                           # folded batch rows
    tile_cap = max(8, max_rows_per_tile // fold)
    n_tiles = _cdiv(bf, tile_cap)
    if bf >= 16:                              # >=2 tiles so both v7x TCs get work
        n_tiles = max(n_tiles, 2)
    tm_f = _round_up(_cdiv(bf, n_tiles), 8)
    bf = n_tiles * tm_f                       # pad only up to the chosen tile
    return bf * fold, bf, tm_f, n_tiles


def actor_model_forward(obs, prepared):
    """obs: (B, obs_dim) float32.  prepared: dict from prepare_params()."""
    B, obs_dim = obs.shape
    fold = prepared["fold"]
    act_dim = prepared["act_dim"]
    assert obs_dim == prepared["obs_dim"], "obs feature dim mismatch"

    pb, bf, tm_f, n_tiles = _choose_tiling(B, fold)
    x = obs if pb == B else jnp.pad(obs, ((0, pb - B), (0, 0)))
    # Free contiguous view: fold consecutive batch rows into the lane dimension.
    xf = x.reshape(bf, fold * obs_dim)

    w1, b1 = prepared["w1"], prepared["b1"]
    w2, b2 = prepared["w2"], prepared["b2"]
    w3, b3 = prepared["w3"], prepared["b3"]

    # Advisory cost (MXU does fold x the logical MACs on the block-diagonal weights).
    flops = 2 * bf * (w1.shape[0] * w1.shape[1]
                      + w2.shape[0] * w2.shape[1]
                      + w3.shape[0] * w3.shape[1])
    bytes_accessed = (xf.size * xf.dtype.itemsize
                      + bf * fold * act_dim * 4
                      + sum(a.size * a.dtype.itemsize for a in (w1, b1, w2, b2, w3, b3)))

    const = lambda i: (0, 0)   # resident weights/biases: same block every grid step
    out_f = pl.pallas_call(
        actor_mlp_kernel,
        out_shape=jax.ShapeDtypeStruct((bf, fold * act_dim), jnp.float32),
        grid_spec=pltpu.PrefetchScalarGridSpec(
            num_scalar_prefetch=0,
            grid=(n_tiles,),
            in_specs=[
                pl.BlockSpec((tm_f, fold * obs_dim), lambda i: (i, 0)),  # streamed obs
                pl.BlockSpec((fold * obs_dim, fold * HID1), const),      # w1 (resident)
                pl.BlockSpec((1, fold * HID1), const),                   # b1
                pl.BlockSpec((fold * HID1, fold * HID2), const),         # w2
                pl.BlockSpec((1, fold * HID2), const),                   # b2
                pl.BlockSpec((fold * HID2, fold * act_dim), const),      # w3
                pl.BlockSpec((1, fold * act_dim), const),                # b3
            ],
            out_specs=pl.BlockSpec((tm_f, fold * act_dim), lambda i: (i, 0)),
        ),
        compiler_params=pltpu.CompilerParams(
            dimension_semantics=("parallel",),   # v7x: split batch tiles across both TCs
            vmem_limit_bytes=32 * 1024 * 1024,   # portable: v5e scoped default is only 16 MiB
        ),
        cost_estimate=pl.CostEstimate(
            flops=flops, transcendentals=0, bytes_accessed=bytes_accessed),
    )(xf, w1, b1, w2, b2, w3, b3)

    out = out_f.reshape(pb, act_dim)   # free view back to (padded_batch, act_dim)
    return out[:B] if pb != B else out


def init_params(key, obs_dim, act_dim):
    """Deterministic synthetic init matching nn.Linear's default range. Weights (in, out)."""
    ks = jax.random.split(key, 6)

    def lin(kw, kb, fan_in, fan_out):
        bound = 1.0 / jnp.sqrt(fan_in)
        w = jax.random.uniform(kw, (fan_in, fan_out), jnp.float32, -bound, bound)
        b = jax.random.uniform(kb, (1, fan_out), jnp.float32, -bound, bound)
        return w, b

    w1, b1 = lin(ks[0], ks[1], obs_dim, HID1)
    w2, b2 = lin(ks[2], ks[3], HID1, HID2)
    w3, b3 = lin(ks[4], ks[5], HID2, act_dim)
    return {"w1": w1, "b1": b1, "w2": w2, "b2": b2, "w3": w3, "b3": b3}


def reference_forward(obs, p):
    h1 = jnp.maximum(obs @ p["w1"] + p["b1"], 0.0)
    h2 = jnp.maximum(h1 @ p["w2"] + p["b2"], 0.0)
    return h2 @ p["w3"] + p["b3"]


if __name__ == "__main__":
    key = jax.random.PRNGKey(0)
    k_obs, k_obs2, k_params = jax.random.split(key, 3)

    obs_dim, act_dim = 32, 8
    params = init_params(k_params, obs_dim, act_dim)

    # One-time weight prep (block-diagonal fold + dtype cast), not per call.
    prep_f32 = prepare_params(params, fold=4, mxu_dtype=jnp.float32)   # exactness checks
    prep_bf16 = prepare_params(params, fold=4)                         # default bf16 MXU path
    prep_v5e = prepare_params(params, fold=2, mxu_dtype=jnp.float32)   # v5e-style 2-way fold

    # 1) Small batch: single grid tile, fold/pad path.
    obs = jax.random.normal(k_obs, (8, obs_dim), jnp.float32)
    ref = reference_forward(obs, params)
    out = jax.block_until_ready(actor_model_forward(obs, prep_f32))
    assert out.shape == (8, act_dim)
    assert jnp.allclose(out, ref, atol=1e-5, rtol=1e-5), "small-batch mismatch"

    # 2) Larger, non-aligned batch: exercises multi-tile grid (>=2 tiles) + batch padding.
    obs2 = jax.random.normal(k_obs2, (200, obs_dim), jnp.float32)
    ref2 = reference_forward(obs2, params)
    out2 = jax.block_until_ready(actor_model_forward(obs2, prep_f32))
    assert out2.shape == (200, act_dim)
    assert jnp.allclose(out2, ref2, atol=1e-5, rtol=1e-5), "gridded-batch mismatch"

    # 3) 2-way fold (v5e-style 128x128 MXU tiling).
    out3 = jax.block_until_ready(actor_model_forward(obs2, prep_v5e))
    assert jnp.allclose(out3, ref2, atol=1e-5, rtol=1e-5), "fold=2 mismatch"

    # 4) bf16 MXU-operand path (f32 accumulation/bias/ReLU) — looser tolerance.
    out4 = jax.block_until_ready(actor_model_forward(obs2, prep_bf16))
    assert jnp.allclose(out4, ref2, atol=3e-2, rtol=3e-2), "bf16 path mismatch"

    print("KERNEL_OK")
</pallas_src>

<mosaic_0001>
module attributes {stable_mosaic.version = 11 : i64} {
  func.func @actor_mlp_kernel(%arg0: i32, %arg1: memref<8x128xf32, #tpu.memory_space<vmem>>, %arg2: memref<128x256xf32, #tpu.memory_space<vmem>>, %arg3: memref<1x256xf32, #tpu.memory_space<vmem>>, %arg4: memref<256x256xf32, #tpu.memory_space<vmem>>, %arg5: memref<1x256xf32, #tpu.memory_space<vmem>>, %arg6: memref<256x32xf32, #tpu.memory_space<vmem>>, %arg7: memref<1x32xf32, #tpu.memory_space<vmem>>, %arg8: memref<8x32xf32, #tpu.memory_space<vmem>>) attributes {dimension_semantics = [#tpu.dimension_semantics<parallel>], iteration_bounds = array<i64: 1>, scalar_prefetch = 0 : i64, scratch_operands = 0 : i64, tpu.core_type = #tpu.core_type<tc>, window_params = [{transform_indices = @transform_0, window_bounds = array<i64: 8, 128>}, {pipeline_mode = #tpu.pipeline_mode<synchronous>, transform_indices = @transform_1, window_bounds = array<i64: 128, 256>}, {pipeline_mode = #tpu.pipeline_mode<synchronous>, transform_indices = @transform_2, window_bounds = array<i64: 1, 256>}, {pipeline_mode = #tpu.pipeline_mode<synchronous>, transform_indices = @transform_3, window_bounds = array<i64: 256, 256>}, {pipeline_mode = #tpu.pipeline_mode<synchronous>, transform_indices = @transform_4, window_bounds = array<i64: 1, 256>}, {pipeline_mode = #tpu.pipeline_mode<synchronous>, transform_indices = @transform_5, window_bounds = array<i64: 256, 32>}, {pipeline_mode = #tpu.pipeline_mode<synchronous>, transform_indices = @transform_6, window_bounds = array<i64: 1, 32>}, {transform_indices = @transform_7, window_bounds = array<i64: 8, 32>}]} {
    %c0 = arith.constant 0 : index
    %c0_0 = arith.constant 0 : index
    %0 = vector.load %arg1[%c0, %c0_0] : memref<8x128xf32, #tpu.memory_space<vmem>>, vector<8x128xf32>
    %c0_1 = arith.constant 0 : index
    %c0_2 = arith.constant 0 : index
    %1 = vector.load %arg2[%c0_1, %c0_2] : memref<128x256xf32, #tpu.memory_space<vmem>>, vector<128x256xf32>
    %cst = arith.constant dense<0.000000e+00> : vector<8x256xf32>
    %2 = tpu.matmul %0, %1, %cst {dimension_numbers = #tpu.dot_dimension_numbers<[1], [0], [0], [1], [0, 0, 1, 1], [], []>} : vector<8x128xf32>, vector<128x256xf32>, vector<8x256xf32> -> vector<8x256xf32>
    %c0_3 = arith.constant 0 : index
    %c0_4 = arith.constant 0 : index
    %3 = vector.load %arg3[%c0_3, %c0_4] : memref<1x256xf32, #tpu.memory_space<vmem>>, vector<1x256xf32>
    %4 = vector.broadcast %3 : vector<1x256xf32> to vector<8x256xf32>
    %5 = arith.addf %2, %4 : vector<8x256xf32>
    %cst_5 = arith.constant 0.000000e+00 : f32
    %6 = vector.broadcast %cst_5 : f32 to vector<8x256xf32>
    %7 = arith.maximumf %5, %6 : vector<8x256xf32>
    %c0_6 = arith.constant 0 : index
    %c0_7 = arith.constant 0 : index
    %8 = vector.load %arg4[%c0_6, %c0_7] : memref<256x256xf32, #tpu.memory_space<vmem>>, vector<256x256xf32>
    %cst_8 = arith.constant dense<0.000000e+00> : vector<8x256xf32>
    %9 = tpu.matmul %7, %8, %cst_8 {dimension_numbers = #tpu.dot_dimension_numbers<[1], [0], [0], [1], [0, 0, 1, 1], [], []>} : vector<8x256xf32>, vector<256x256xf32>, vector<8x256xf32> -> vector<8x256xf32>
    %c0_9 = arith.constant 0 : index
    %c0_10 = arith.constant 0 : index
    %10 = vector.load %arg5[%c0_9, %c0_10] : memref<1x256xf32, #tpu.memory_space<vmem>>, vector<1x256xf32>
    %11 = vector.broadcast %10 : vector<1x256xf32> to vector<8x256xf32>
    %12 = arith.addf %9, %11 : vector<8x256xf32>
    %cst_11 = arith.constant 0.000000e+00 : f32
    %13 = vector.broadcast %cst_11 : f32 to vector<8x256xf32>
    %14 = arith.maximumf %12, %13 : vector<8x256xf32>
    %c0_12 = arith.constant 0 : index
    %c0_13 = arith.constant 0 : index
    %15 = vector.load %arg6[%c0_12, %c0_13] : memref<256x32xf32, #tpu.memory_space<vmem>>, vector<256x32xf32>
    %cst_14 = arith.constant dense<0.000000e+00> : vector<8x32xf32>
    %16 = tpu.matmul %14, %15, %cst_14 {dimension_numbers = #tpu.dot_dimension_numbers<[1], [0], [0], [1], [0, 0, 1, 1], [], []>} : vector<8x256xf32>, vector<256x32xf32>, vector<8x32xf32> -> vector<8x32xf32>
    %c0_15 = arith.constant 0 : index
    %c0_16 = arith.constant 0 : index
    %17 = vector.load %arg7[%c0_15, %c0_16] : memref<1x32xf32, #tpu.memory_space<vmem>>, vector<1x32xf32>
    %18 = vector.broadcast %17 : vector<1x32xf32> to vector<8x32xf32>
    %19 = arith.addf %16, %18 : vector<8x32xf32>
    %c0_17 = arith.constant 0 : index
    %c0_18 = arith.constant 0 : index
    %20 = vector.load %arg8[%c0_17, %c0_18] : memref<8x32xf32, #tpu.memory_space<vmem>>, vector<8x32xf32>
    tpu.vector_store %arg8[%c0_17, %c0_18], %19 {strides = array<i32>} : memref<8x32xf32, #tpu.memory_space<vmem>>, vector<8x32xf32>,
    return
  }
  func.func @transform_0(%arg0: i32) -> (i32, i32) {
    %c0_i32 = arith.constant 0 : i32
    %c0_i32_0 = arith.constant 0 : i32
    return %arg0, %c0_i32 : i32, i32
  }
  func.func @transform_1(%arg0: i32) -> (i32, i32) {
    %c0_i32 = arith.constant 0 : i32
    %c0_i32_0 = arith.constant 0 : i32
    %c0_i32_1 = arith.constant 0 : i32
    return %c0_i32, %c0_i32_0 : i32, i32
  }
  func.func @transform_2(%arg0: i32) -> (i32, i32) {
    %c0_i32 = arith.constant 0 : i32
    %c0_i32_0 = arith.constant 0 : i32
    %c0_i32_1 = arith.constant 0 : i32
    return %c0_i32, %c0_i32_0 : i32, i32
  }
  func.func @transform_3(%arg0: i32) -> (i32, i32) {
    %c0_i32 = arith.constant 0 : i32
    %c0_i32_0 = arith.constant 0 : i32
    %c0_i32_1 = arith.constant 0 : i32
    return %c0_i32, %c0_i32_0 : i32, i32
  }
  func.func @transform_4(%arg0: i32) -> (i32, i32) {
    %c0_i32 = arith.constant 0 : i32
    %c0_i32_0 = arith.constant 0 : i32
    %c0_i32_1 = arith.constant 0 : i32
    return %c0_i32, %c0_i32_0 : i32, i32
  }
  func.func @transform_5(%arg0: i32) -> (i32, i32) {
    %c0_i32 = arith.constant 0 : i32
    %c0_i32_0 = arith.constant 0 : i32
    %c0_i32_1 = arith.constant 0 : i32
    return %c0_i32, %c0_i32_0 : i32, i32
  }
  func.func @transform_6(%arg0: i32) -> (i32, i32) {
    %c0_i32 = arith.constant 0 : i32
    %c0_i32_0 = arith.constant 0 : i32
    %c0_i32_1 = arith.constant 0 : i32
    return %c0_i32, %c0_i32_0 : i32, i32
  }
  func.func @transform_7(%arg0: i32) -> (i32, i32) {
    %c0_i32 = arith.constant 0 : i32
    %c0_i32_0 = arith.constant 0 : i32
    return %arg0, %c0_i32 : i32, i32
  }
}

</mosaic_0001>

<bundles_post_ra>
// kernel: tpu_custom_call.1
= control target key start
LH: loop header
LB: loop body
LE: loop exit
PB: predicated region body
PF: predicated region fallthrough
CT: control target
= control target key end

     0   :  { %12 = vsyncpa [#allocation3], 0  ;;  %s924_s0 = inlined_call_operand.vmem [shape: f32[8,128], index: 0, kind: input, shape index: {}]   ;;  %s925_s1 = inlined_call_operand.vmem [shape: f32[128,256], index: 1, kind: input, shape index: {}]   ;;  %s926_s2 = inlined_call_operand.vmem [shape: f32[1,256], index: 2, kind: input, shape index: {}]   ;;  %s927_s3 = inlined_call_operand.hbm [shape: f32[256,256], index: 3, kind: input, shape index: {}]   ;;  %s928_s4 = inlined_call_operand.vmem [shape: f32[1,256], index: 4, kind: input, shape index: {}]   ;;  %s929_s5 = inlined_call_operand.vmem [shape: f32[256,32], index: 5, kind: input, shape index: {}]   ;;  %s930_s6 = inlined_call_operand.vmem [shape: f32[1,32], index: 6, kind: input, shape index: {}]   ;;  %s931_s7 = inlined_call_operand.hbm [shape: f32[8,32], index: 7, kind: output, shape index: {}]  }
   0x1   :  { %13 = vsyncpa [#allocation4], 0  ;;  %s651_s24 = smov [#allocation2]   ;;  %s603_s28 = scalar_lea.hbm %s927_s3, 8192 }
   0x2   :  { %s25_s25 = sshll.u32 %s651_s24, 4  ;;  %p604_p0 = scmp.ne.s32.totalorder %s927_s3, %s603_s28  ;;  %s26_s25 = int_to_ptr.vmem [resolvable:$true] %s25_s25 }
   0x3   :  { %p607_p1 = scmp.lt.u32.totalorder %s603_s28, %s927_s3 }
   0x5   :  { %p609_p2 = pnand %p607_p1, %p604_p0 }
   0x7   :  { %612 = shalt.err (!%p609_p2)
}
   0x8   :  { %s613_s10 = scalar_lea.vmem %s26_s25, 8192  ;;  %p618_p4 = scmp.lt.s32.totalorder %s26_s25, %s26_s25 }
   0x9   :  { %p614_p3 = scmp.ne.s32.totalorder %s26_s25, %s613_s10  ;;  %p619_p5 = scmp.lt.s32.totalorder %s613_s10, %s613_s10 }
   0xb   :  { %p620_p6 = por %p619_p5, %p618_p4 }
   0xd   :  { %p621_p7 = pnand %p620_p6, %p614_p3 }
   0xf   :  { %624 = shalt.err (!%p621_p7)
}
  0x10   :  { %s652_s11 = smov 256   ;;  %s653_s12 = smov 16  }
  0x11   :  { %31 = dma.hbm_to_vmem [thread:$0]  %s927_s3, 8192, %s26_s25, [#allocation3], %s652_s11, %s652_s11, %s653_s12  }
  0x12   :  { %647 = dma.done.wait [#allocation3], 8192  }
  0x13   :  { %648 = vsyncadd [#allocation3], 4294959104  ;;  %v654_v0 = vmov 0.0   ;;  %v43_v1 = vld [vmem:[%s925_s1 + $0x8] sm:$0xff]  ;;  %v45_v2 = vld [vmem:[%s925_s1 + $0x18] sm:$0xff]  ;;  %s655_s3 = smov [#allocation5]  }
  0x14   :  { %150 = vmatprep.mubr.f32.mxu0 %v654_v0  ;;  %v42_v3 = vld [vmem:[%s925_s1] sm:$0xff]  ;;  %v470_v4 = vpack.c.bf16 %v45_v2, %v43_v1  ;;  %v44_v5 = vld [vmem:[%s925_s1 + $0x10] sm:$0xff]  ;;  %v47_v6 = vld [vmem:[%s925_s1 + $0x28] sm:$0xff]  ;;  %s425_s23 = sshll.u32 %s655_s3, 4  ;;  %vm417_vm0 = vcmask 261120   ;;  %s426_s23 = int_to_ptr.vmem [resolvable:$true] %s425_s23 }
  0x15   :  { %v49_v7 = vld [vmem:[%s925_s1 + $0x38] sm:$0xff]  ;;  %v472_v8 = vpack.c.bf16 %v44_v5, %v42_v3  ;;  %v46_v10 = vld [vmem:[%s925_s1 + $0x20] sm:$0xff]  ;;  %v48_v11 = vld [vmem:[%s925_s1 + $0x30] sm:$0xff]  ;;  %p630_p9 = scmp.lt.s32.totalorder %s426_s23, %s426_s23 }
  0x16   :  { %v474_v9 = vpack.c.bf16 %v49_v7, %v47_v6  ;;  %v51_v12 = vld [vmem:[%s925_s1 + $0x48] sm:$0xff]  ;;  %471 = vmatprep.subr.bf16.mxu0 %v470_v4  ;;  %v53_v13 = vld [vmem:[%s925_s1 + $0x58] sm:$0xff]  ;;  %v476_v14 = vpack.c.bf16 %v48_v11, %v46_v10  ;;  %v50_v16 = vld [vmem:[%s925_s1 + $0x40] sm:$0xff] }
  0x17   :  { %473 = vmatpush1.bf16.msra.mxu0 %v472_v8  ;;  %v478_v15 = vpack.c.bf16 %v53_v13, %v51_v12  ;;  %v52_v17 = vld [vmem:[%s925_s1 + $0x50] sm:$0xff]  ;;  %v55_v18 = vld [vmem:[%s925_s1 + $0x68] sm:$0xff]  ;;  %v57_v19 = vld [vmem:[%s925_s1 + $0x78] sm:$0xff] }
  0x18   :  { %475 = vmatprep.subr.bf16.mxu0 %v474_v9  ;;  %v480_v20 = vpack.c.bf16 %v52_v17, %v50_v16  ;;  %v482_v21 = vpack.c.bf16 %v57_v19, %v55_v18  ;;  %v54_v22 = vld [vmem:[%s925_s1 + $0x60] sm:$0xff]  ;;  %v56_v23 = vld [vmem:[%s925_s1 + $0x70] sm:$0xff]  ;;  %v59_v24 = vld [vmem:[%s925_s1 + $0x88] sm:$0xff] }
  0x19   :  { %v61_v25 = vld [vmem:[%s925_s1 + $0x98] sm:$0xff]  ;;  %v58_v26 = vld [vmem:[%s925_s1 + $0x80] sm:$0xff]  ;;  %v60_v27 = vld [vmem:[%s925_s1 + $0x90] sm:$0xff]  ;;  %v484_v31 = vpack.c.bf16 %v56_v23, %v54_v22 }
  0x1a   :  { %v160_v28 = vld [vmem:[#allocation2 + $0x8] sm:$0xff]  ;;  %v162_v29 = vld [vmem:[#allocation2 + $0x18] sm:$0xff]  ;;  %v159_v30 = vld [vmem:[#allocation2] sm:$0xff]  ;;  %v486_v36 = vpack.c.bf16 %v61_v25, %v59_v24  ;;  %v488_v46 = vpack.c.bf16 %v60_v27, %v58_v26 }
  0x1b   :  { %477 = vmatpush1.bf16.msra.mxu0 %v476_v14  ;;  %v502_v32 = vpack.c.bf16 %v162_v29, %v160_v28  ;;  %v161_v33 = vld [vmem:[#allocation2 + $0x10] sm:$0xff]  ;;  %v164_v34 = vld [vmem:[#allocation2 + $0x28] sm:$0xff]  ;;  %v166_v35 = vld [vmem:[#allocation2 + $0x38] sm:$0xff] }
  0x1c   :  { %479 = vmatprep.subr.bf16.mxu0 %v478_v15  ;;  %v504_v37 = vpack.c.bf16 %v161_v33, %v159_v30  ;;  %v506_v38 = vpack.c.bf16 %v166_v35, %v164_v34  ;;  %v163_v39 = vld [vmem:[#allocation2 + $0x20] sm:$0xff]  ;;  %v165_v40 = vld [vmem:[#allocation2 + $0x30] sm:$0xff]  ;;  %v168_v41 = vld [vmem:[#allocation2 + $0x48] sm:$0xff] }
  0x1d   :  { %v63_v42 = vld [vmem:[%s925_s1 + $0xa8] sm:$0xff]  ;;  %v65_v43 = vld [vmem:[%s925_s1 + $0xb8] sm:$0xff]  ;;  %503 = vmatprep.subr.bf16.mxu1 %v502_v32  ;;  %v508_v45 = vpack.c.bf16 %v165_v40, %v163_v39  ;;  %v62_v47 = vld [vmem:[%s925_s1 + $0xa0] sm:$0xff] }
  0x1e   :  { %v170_v44 = vld [vmem:[#allocation2 + $0x58] sm:$0xff]  ;;  %505 = vmatpush1.bf16.msra.mxu1 %v504_v37  ;;  %v167_v49 = vld [vmem:[#allocation2 + $0x40] sm:$0xff]  ;;  %v169_v50 = vld [vmem:[#allocation2 + $0x50] sm:$0xff]  ;;  %v490_v51 = vpack.c.bf16 %v65_v43, %v63_v42 }
  0x1f   :  { %481 = vmatpush1.bf16.msra.mxu0 %v480_v20  ;;  %507 = vmatprep.subr.bf16.mxu1 %v506_v38  ;;  %v510_v48 = vpack.c.bf16 %v170_v44, %v168_v41  ;;  %v64_v52 = vld [vmem:[%s925_s1 + $0xb0] sm:$0xff]  ;;  %v172_v53 = vld [vmem:[#allocation2 + $0x68] sm:$0xff]  ;;  %v174_v54 = vld [vmem:[#allocation2 + $0x78] sm:$0xff]  ;;  %v512_v57 = vpack.c.bf16 %v169_v50, %v167_v49 }
  0x20   :  { %483 = vmatprep.subr.bf16.mxu0 %v482_v21  ;;  %v67_v55 = vld [vmem:[%s925_s1 + $0xc8] sm:$0xff]  ;;  %v69_v56 = vld [vmem:[%s925_s1 + $0xd8] sm:$0xff]  ;;  %v492_v58 = vpack.c.bf16 %v64_v52, %v62_v47  ;;  %v66_v59 = vld [vmem:[%s925_s1 + $0xc0] sm:$0xff]  ;;  %v514_v60 = vpack.c.bf16 %v174_v54, %v172_v53 }
  0x21   :  { %v171_v61 = vld [vmem:[#allocation2 + $0x60] sm:$0xff]  ;;  %v173_v62 = vld [vmem:[#allocation2 + $0x70] sm:$0xff]  ;;  %v494_v63 = vpack.c.bf16 %v69_v56, %v67_v55  ;;  %v176_v1 = vld [vmem:[#allocation2 + $0x88] sm:$0xff] }
  0x22   :  { %509 = vmatpush1.bf16.msra.mxu1 %v508_v45  ;;  %v68_v0 = vld [vmem:[%s925_s1 + $0xd0] sm:$0xff]  ;;  %v178_v2 = vld [vmem:[#allocation2 + $0x98] sm:$0xff]  ;;  %v71_v3 = vld [vmem:[%s925_s1 + $0xe8] sm:$0xff]  ;;  %v516_v5 = vpack.c.bf16 %v173_v62, %v171_v61 }
  0x23   :  { %485 = vmatpush1.bf16.msra.mxu0 %v484_v31  ;;  %511 = vmatprep.subr.bf16.mxu1 %v510_v48  ;;  %v73_v4 = vld [vmem:[%s925_s1 + $0xf8] sm:$0xff]  ;;  %v496_v6 = vpack.c.bf16 %v68_v0, %v66_v59  ;;  %v70_v7 = vld [vmem:[%s925_s1 + $0xe0] sm:$0xff]  ;;  %v518_v8 = vpack.c.bf16 %v178_v2, %v176_v1  ;;  %v177_v10 = vld [vmem:[#allocation2 + $0x90] sm:$0xff] }
  0x24   :  { %487 = vmatprep.subr.bf16.mxu0 %v486_v36  ;;  %v175_v9 = vld [vmem:[#allocation2 + $0x80] sm:$0xff]  ;;  %v498_v11 = vpack.c.bf16 %v73_v4, %v71_v3  ;;  %v72_v12 = vld [vmem:[%s925_s1 + $0xf0] sm:$0xff]  ;;  %v180_v13 = vld [vmem:[#allocation2 + $0xa8] sm:$0xff] }
  0x25   :  { %v182_v14 = vld [vmem:[#allocation2 + $0xb8] sm:$0xff]  ;;  %v520_v15 = vpack.c.bf16 %v177_v10, %v175_v9  ;;  %v500_v16 = vpack.c.bf16 %v72_v12, %v70_v7  ;;  %v179_v18 = vld [vmem:[#allocation2 + $0xa0] sm:$0xff]  ;;  %v181_v19 = vld [vmem:[#allocation2 + $0xb0] sm:$0xff] }
  0x26   :  { %513 = vmatpush1.bf16.msra.mxu1 %v512_v57  ;;  %v522_v17 = vpack.c.bf16 %v182_v14, %v180_v13  ;;  %v184_v20 = vld [vmem:[#allocation2 + $0xc8] sm:$0xff]  ;;  %v186_v21 = vld [vmem:[#allocation2 + $0xd8] sm:$0xff]  ;;  %v524_v22 = vpack.c.bf16 %v181_v19, %v179_v18  ;;  %v41_v23 = vld [vmem:[%s924_s0] sm:$0xff] }
  0x27   :  { %489 = vmatpush1.bf16.msra.mxu0 %v488_v46  ;;  %515 = vmatprep.subr.bf16.mxu1 %v514_v60  ;;  %v526_v24 = vpack.c.bf16 %v186_v21, %v184_v20  ;;  %v183_v25 = vld [vmem:[#allocation2 + $0xc0] sm:$0xff]  ;;  %v185_v26 = vld [vmem:[#allocation2 + $0xd0] sm:$0xff]  ;;  %v188_v27 = vld [vmem:[#allocation2 + $0xe8] sm:$0xff] }
  0x28   :  { %491 = vmatprep.subr.bf16.mxu0 %v490_v51  ;;  %v190_v28 = vld [vmem:[#allocation2 + $0xf8] sm:$0xff]  ;;  %v528_v29 = vpack.c.bf16 %v185_v26, %v183_v25  ;;  %v187_v31 = vld [vmem:[#allocation2 + $0xe0] sm:$0xff]  ;;  %v189_v32 = vld [vmem:[#allocation2 + $0xf0] sm:$0xff] }
  0x29   :  { %v530_v30 = vpack.c.bf16 %v190_v28, %v188_v27  ;;  %v192_v33 = vld [vmem:[#allocation2 + $0x108] sm:$0xff]  ;;  %v194_v34 = vld [vmem:[#allocation2 + $0x118] sm:$0xff]  ;;  %v532_v35 = vpack.c.bf16 %v189_v32, %v187_v31  ;;  %v191_v37 = vld [vmem:[#allocation2 + $0x100] sm:$0xff] }
  0x2a   :  { %517 = vmatpush1.bf16.msra.mxu1 %v516_v5  ;;  %v534_v36 = vpack.c.bf16 %v194_v34, %v192_v33  ;;  %v193_v38 = vld [vmem:[#allocation2 + $0x110] sm:$0xff]  ;;  %v196_v39 = vld [vmem:[#allocation2 + $0x128] sm:$0xff]  ;;  %v198_v40 = vld [vmem:[#allocation2 + $0x138] sm:$0xff] }
  0x2b   :  { %493 = vmatpush1.bf16.msra.mxu0 %v492_v58  ;;  %519 = vmatprep.subr.bf16.mxu1 %v518_v8  ;;  %v536_v41 = vpack.c.bf16 %v193_v38, %v191_v37  ;;  %v538_v42 = vpack.c.bf16 %v198_v40, %v196_v39  ;;  %v195_v43 = vld [vmem:[#allocation2 + $0x120] sm:$0xff]  ;;  %v197_v44 = vld [vmem:[#allocation2 + $0x130] sm:$0xff]  ;;  %v200_v45 = vld [vmem:[#allocation2 + $0x148] sm:$0xff] }
  0x2c   :  { %495 = vmatprep.subr.bf16.mxu0 %v494_v63  ;;  %v202_v46 = vld [vmem:[#allocation2 + $0x158] sm:$0xff]  ;;  %v540_v47 = vpack.c.bf16 %v197_v44, %v195_v43  ;;  %v199_v49 = vld [vmem:[#allocation2 + $0x140] sm:$0xff]  ;;  %v201_v50 = vld [vmem:[#allocation2 + $0x150] sm:$0xff] }
  0x2d   :  { %v542_v48 = vpack.c.bf16 %v202_v46, %v200_v45  ;;  %v204_v51 = vld [vmem:[#allocation2 + $0x168] sm:$0xff]  ;;  %v206_v52 = vld [vmem:[#allocation2 + $0x178] sm:$0xff]  ;;  %v544_v53 = vpack.c.bf16 %v201_v50, %v199_v49  ;;  %v203_v55 = vld [vmem:[#allocation2 + $0x160] sm:$0xff] }
  0x2e   :  { %521 = vmatpush1.bf16.msra.mxu1 %v520_v15  ;;  %v546_v54 = vpack.c.bf16 %v206_v52, %v204_v51  ;;  %v205_v56 = vld [vmem:[#allocation2 + $0x170] sm:$0xff]  ;;  %v208_v57 = vld [vmem:[#allocation2 + $0x188] sm:$0xff]  ;;  %v210_v58 = vld [vmem:[#allocation2 + $0x198] sm:$0xff] }
  0x2f   :  { %497 = vmatpush1.bf16.msra.mxu0 %v496_v6  ;;  %523 = vmatprep.subr.bf16.mxu1 %v522_v17  ;;  %v548_v59 = vpack.c.bf16 %v205_v56, %v203_v55  ;;  %v550_v60 = vpack.c.bf16 %v210_v58, %v208_v57  ;;  %v207_v61 = vld [vmem:[#allocation2 + $0x180] sm:$0xff]  ;;  %v209_v62 = vld [vmem:[#allocation2 + $0x190] sm:$0xff]  ;;  %v212_v63 = vld [vmem:[#allocation2 + $0x1a8] sm:$0xff]  ;;  %v76_v57 = vlaneseq }
  0x30   :  { %499 = vmatprep.subr.bf16.mxu0 %v498_v11  ;;  %v214_v0 = vld [vmem:[#allocation2 + $0x1b8] sm:$0xff]  ;;  %v552_v1 = vpack.c.bf16 %v209_v62, %v207_v61  ;;  %v211_v3 = vld [vmem:[#allocation2 + $0x1a0] sm:$0xff]  ;;  %v213_v4 = vld [vmem:[#allocation2 + $0x1b0] sm:$0xff] }
  0x31   :  { %v554_v2 = vpack.c.bf16 %v214_v0, %v212_v63  ;;  %v216_v5 = vld [vmem:[#allocation2 + $0x1c8] sm:$0xff]  ;;  %v218_v6 = vld [vmem:[#allocation2 + $0x1d8] sm:$0xff]  ;;  %v556_v7 = vpack.c.bf16 %v213_v4, %v211_v3  ;;  %v215_v9 = vld [vmem:[#allocation2 + $0x1c0] sm:$0xff]  ;;  %v77_v58 = vshrl.u32 %v76_v57, 7 }
  0x32   :  { %525 = vmatpush1.bf16.msra.mxu1 %v524_v22  ;;  %v558_v8 = vpack.c.bf16 %v218_v6, %v216_v5  ;;  %v217_v10 = vld [vmem:[#allocation2 + $0x1d0] sm:$0xff]  ;;  %v220_v12 = vld [vmem:[#allocation2 + $0x1e8] sm:$0xff]  ;;  %v222_v13 = vld [vmem:[#allocation2 + $0x1f8] sm:$0xff] }
  0x33   :  { %501 = vmatpush1.bf16.msra.mxu0 %v500_v16  ;;  %527 = vmatprep.subr.bf16.mxu1 %v526_v24  ;;  %v560_v11 = vpack.c.bf16 %v217_v10, %v215_v9  ;;  %v562_v14 = vpack.c.bf16 %v222_v13, %v220_v12  ;;  %v219_v15 = vld [vmem:[#allocation2 + $0x1e0] sm:$0xff]  ;;  %v221_v16 = vld [vmem:[#allocation2 + $0x1f0] sm:$0xff]  ;;  %v325_v19 = vld [vmem:[%s929_s5 + $0x88] sm:$0xff]  ;;  %v82_v61 = vsub.s32 1, %v77_v58 }
  0x34   :  { %v564_v17 = vpack.c.bf16 %v221_v16, %v219_v15  ;;  %v324_v18 = vld [vmem:[%s929_s5 + $0x80] sm:$0xff]  ;;  %v309_v22 = vld [vmem:[%s929_s5 + $0x8] sm:$0xff]  ;;  %v327_v24 = vld [vmem:[%s929_s5 + $0x98] sm:$0xff] }
  0x35   :  { %v308_v20 = vld [vmem:[%s929_s5] sm:$0xff]  ;;  %v566_v21 = vpack.c.bf16 %v325_v19, %v324_v18  ;;  %v310_v27 = vld [vmem:[%s929_s5 + $0x10] sm:$0xff]  ;;  %v311_v28 = vld [vmem:[%s929_s5 + $0x18] sm:$0xff] }
  0x36   :  { %151 = vmatmul.mubr.f32.vlgmr.msra.gmra.mrb[0].mxu0 %v41_v23  ;;  %529 = vmatpush1.bf16.msra.mxu1 %v528_v29  ;;  %v326_v23 = vld [vmem:[%s929_s5 + $0x90] sm:$0xff]  ;;  %v568_v25 = vpack.c.bf16 %v309_v22, %v308_v20  ;;  %v328_v29 = vld [vmem:[%s929_s5 + $0xa0] sm:$0xff]  ;;  %v572_v31 = vpack.c.bf16 %v311_v28, %v310_v27  ;;  %v313_v34 = vld [vmem:[%s929_s5 + $0x28] sm:$0xff] }
  0x37   :  { %531 = vmatprep.subr.bf16.mxu1 %v530_v30  ;;  %v570_v26 = vpack.c.bf16 %v327_v24, %v326_v23  ;;  %567 = vmatprep.subr.bf16.mxu0 %v566_v21  ;;  %v329_v30 = vld [vmem:[%s929_s5 + $0xa8] sm:$0xff]  ;;  %v312_v33 = vld [vmem:[%s929_s5 + $0x20] sm:$0xff]  ;;  %v314_v39 = vld [vmem:[%s929_s5 + $0x30] sm:$0xff] }
  0x38   :  { %569 = vmatpush3.bf16.msra.mxu0 %v568_v25  ;;  %v574_v32 = vpack.c.bf16 %v329_v30, %v328_v29  ;;  %v576_v37 = vpack.c.bf16 %v313_v34, %v312_v33  ;;  %v315_v40 = vld [vmem:[%s929_s5 + $0x38] sm:$0xff]  ;;  %v316_v45 = vld [vmem:[%s929_s5 + $0x40] sm:$0xff]  ;;  %v317_v46 = vld [vmem:[%s929_s5 + $0x48] sm:$0xff] }
  0x39   :  { %571 = vmatprep.subr.bf16.mxu0 %v570_v26  ;;  %v580_v43 = vpack.c.bf16 %v315_v40, %v314_v39  ;;  %v584_v49 = vpack.c.bf16 %v317_v46, %v316_v45  ;;  %v318_v51 = vld [vmem:[%s929_s5 + $0x50] sm:$0xff]  ;;  %v319_v52 = vld [vmem:[%s929_s5 + $0x58] sm:$0xff]  ;;  %v320_v6 = vld [vmem:[%s929_s5 + $0x60] sm:$0xff] }
  0x3a   :  { %533 = vmatpush1.bf16.msra.mxu1 %v532_v35  ;;  %v330_v35 = vld [vmem:[%s929_s5 + $0xb0] sm:$0xff]  ;;  %v588_v55 = vpack.c.bf16 %v319_v52, %v318_v51  ;;  %v339_v10 = vld [vmem:[%s929_s5 + $0xf8] sm:$0xff]  ;;  %v223_v15 = vld [vmem:[%s928_s4] sm:$0x3]  ;;  %s625_s4 = scalar_lea.vmem %s426_s23, 128 }
  0x3b   :  { %535 = vmatprep.subr.bf16.mxu1 %v534_v36  ;;  %v331_v36 = vld [vmem:[%s929_s5 + $0xb8] sm:$0xff]  ;;  %v338_v9 = vld [vmem:[%s929_s5 + $0xf0] sm:$0xff]  ;;  %v434_v25 = vld [vmem:[%s930_s6] ss:$0 sm:$0xff]  ;;  %p626_p8 = scmp.ne.s32.totalorder %s426_s23, %s625_s4  ;;  %p631_p10 = scmp.lt.s32.totalorder %s625_s4, %s625_s4 }
  0x3c   :  { %573 = vmatpush3.bf16.msra.mxu0 %v572_v31  ;;  %v578_v38 = vpack.c.bf16 %v331_v36, %v330_v35  ;;  %v322_v12 = vld [vmem:[%s929_s5 + $0x70] sm:$0xff]  ;;  %v323_v13 = vld [vmem:[%s929_s5 + $0x78] sm:$0xff] }
  0x3d   :  { %575 = vmatprep.subr.bf16.mxu0 %v574_v32  ;;  %p632_p11 = por %p631_p10, %p630_p9 }
  0x3e   :  { %537 = vmatpush1.bf16.msra.mxu1 %v536_v41  ;;  %v332_v41 = vld [vmem:[%s929_s5 + $0xc0] sm:$0xff] }
  0x3f   :  { %539 = vmatprep.subr.bf16.mxu1 %v538_v42  ;;  %v333_v42 = vld [vmem:[%s929_s5 + $0xc8] sm:$0xff]  ;;  %p633_p12 = pnand %p632_p11, %p626_p8 }
  0x40   :  { %577 = vmatpush3.bf16.msra.mxu0 %v576_v37  ;;  %v582_v44 = vpack.c.bf16 %v333_v42, %v332_v41 }
  0x41   :  { %579 = vmatprep.subr.bf16.mxu0 %v578_v38 }
  0x42   :  { %541 = vmatpush1.bf16.msra.mxu1 %v540_v47  ;;  %v334_v47 = vld [vmem:[%s929_s5 + $0xd0] sm:$0xff] }
  0x43   :  { %543 = vmatprep.subr.bf16.mxu1 %v542_v48  ;;  %v335_v48 = vld [vmem:[%s929_s5 + $0xd8] sm:$0xff] }
  0x44   :  { %581 = vmatpush3.bf16.msra.mxu0 %v580_v43  ;;  %v586_v50 = vpack.c.bf16 %v335_v48, %v334_v47 }
  0x45   :  { %583 = vmatprep.subr.bf16.mxu0 %v582_v44 }
  0x46   :  { %545 = vmatpush1.bf16.msra.mxu1 %v544_v53  ;;  %v336_v53 = vld [vmem:[%s929_s5 + $0xe0] sm:$0xff] }
  0x47   :  { %547 = vmatprep.subr.bf16.mxu1 %v546_v54  ;;  %v337_v54 = vld [vmem:[%s929_s5 + $0xe8] sm:$0xff] }
  0x48   :  { %585 = vmatpush3.bf16.msra.mxu0 %v584_v49  ;;  %v590_v56 = vpack.c.bf16 %v337_v54, %v336_v53 }
  0x49   :  { %587 = vmatprep.subr.bf16.mxu0 %v586_v50 }
  0x4a   :  { %549 = vmatpush1.bf16.msra.mxu1 %v548_v59  ;;  %v78_v59 = vsub.s32 0, %v77_v58 }
  0x4b   :  { %551 = vmatprep.subr.bf16.mxu1 %v550_v60  ;;  %v74_v60 = vld [vmem:[%s926_s2] sm:$0x3] }
  0x4c   :  { %589 = vmatpush3.bf16.msra.mxu0 %v588_v55  ;;  %v79_v62 = vrot.slane %v74_v60, %v78_v59  ;;  %v83_v63 = vrot.slane %v74_v60, %v82_v61  ;;  %v228_v16 = vrot.slane %v223_v15, %v78_v59 }
  0x4d   :  { %591 = vmatprep.subr.bf16.mxu0 %v590_v56 }
  0x4e   :  { %553 = vmatpush1.bf16.msra.mxu1 %v552_v1 }
  0x4f   :  { %555 = vmatprep.subr.bf16.mxu1 %v554_v2 }
  0x52   :  { %557 = vmatpush1.bf16.msra.mxu1 %v556_v7  ;;  %v321_v7 = vld [vmem:[%s929_s5 + $0x68] sm:$0xff] }
  0x53   :  { %559 = vmatprep.subr.bf16.mxu1 %v558_v8  ;;  %v592_v8 = vpack.c.bf16 %v321_v7, %v320_v6 }
  0x55   :  { %593 = vmatpush3.bf16.msra.mxu0 %v592_v8 }
  0x56   :  { %561 = vmatpush1.bf16.msra.mxu1 %v560_v11  ;;  %v594_v11 = vpack.c.bf16 %v339_v10, %v338_v9 }
  0x57   :  { %563 = vmatprep.subr.bf16.mxu1 %v562_v14  ;;  %v596_v14 = vpack.c.bf16 %v323_v13, %v322_v12 }
  0x58   :  { %595 = vmatprep.subr.bf16.mxu0 %v594_v11 }
  0x59   :  { %597 = vmatpush3.bf16.msra.mxu0 %v596_v14 }
  0x5a   :  { %565 = vmatpush1.bf16.msra.mxu1 %v564_v17  ;;  %v232_v17 = vrot.slane %v223_v15, %v82_v61 }
 0x109   :  { %v152_v0 = vpop.f32.mrb[0].mxu0 }
 0x10a   :  { %v153_v1 = vadd.f32 %v152_v0, %v79_v62  ;;  %v154_v2 = vpop.f32.mrb[1].mxu0 }
 0x10b   :  { %v155_v3 = vadd.f32 %v154_v2, %v83_v63 }
 0x10c   :  { %v157_v5 = vmax.f32 %v153_v1, 0.0 }
 0x10d   :  { %v158_v4 = vmax.f32 %v155_v3, 0.0 }
 0x10f   :  { %299 = vmatprep.mubr.f32.mxu1 %v158_v4 }
 0x110   :  { %300 = vmatmul.mubr.f32.vlgmr.msra.gmra.mrb[0].mxu1 %v157_v5 }
 0x1e3   :  { %v301_v18 = vpop.f32.mrb[0].mxu1 }
 0x1e4   :  { %v302_v19 = vadd.f32 %v301_v18, %v228_v16  ;;  %v303_v20 = vpop.f32.mrb[1].mxu1 }
 0x1e5   :  { %v304_v21 = vadd.f32 %v303_v20, %v232_v17 }
 0x1e6   :  { %v306_v23 = vmax.f32 %v302_v19, 0.0 }
 0x1e7   :  { %v307_v22 = vmax.f32 %v304_v21, 0.0 }
 0x1e9   :  { %411 = vmatprep.mubr.f32.mxu0 %v307_v22 }
 0x1ea   :  { %412 = vmatmul.mubr.f32.vlgmr.msra.gmra.mrb[2].mxu0 %v306_v23 }
 0x2bd   :  { %v467_v24 = vpop.f32.mrb[2].mxu0 }
 0x2be   :  { %v468_v26 = vpop.f32.mrb[3].mxu0 }
 0x2bf   :  { %v469_v27 = vadd.f32 %v468_v26, %v467_v24 }
 0x2c1   :  { %v414_v28 = vadd.f32 %v469_v27, %v434_v25 }
 0x2c3   :  { %418 = vst.msk [vmem:[#allocation5] sm:$0xff] %vm417_vm0, %v414_v28 }
 0x2c4   :  { %636 = shalt.err (!%p633_p12)
}
 0x2c5   :  { %s637_s26 = scalar_lea.hbm %s931_s7, 128 }
 0x2c6   :  { %p638_p13 = scmp.ne.s32.totalorder %s931_s7, %s637_s26  ;;  %p641_p0 = scmp.lt.u32.totalorder %s637_s26, %s931_s7 }
 0x2c8   :  { %p643_p1 = pnand %p641_p0, %p638_p13 }
 0x2ca   :  { %646 = shalt.err (!%p643_p1)
}
 0x2cb   :  { %428 = dma.vmem_to_hbm [thread:$0]  %s426_s23, 128, %s931_s7, [#allocation4]  }
 0x2cc   :  { %649 = dma.done.wait [#allocation4], 128  }
 0x2cd   :  { %650 = vsyncadd [#allocation4], 4294967168 }
 0x2ce   :  { %432 = vsyncpa [#allocation3], 1 }
 0x2cf   :  { %433 = vsyncpa [#allocation4], 1 }

</bundles_post_ra>
